<compile_context>
chip_gen: v6e
topology: v6e:2x2x1
jax: 0.10.0
libtpu: 0.0.40
codegen_flags: <defaults>
</compile_context>

<pallas_src>
import functools
import numpy as np
import jax
import jax.numpy as jnp
from jax.experimental import pallas as pl
from jax.experimental.pallas import tpu as pltpu

BN_SCALE = float(1.0 / np.sqrt(1.0 + 1e-5))  # eval-mode BN with default stats

_K_CAP = 2048      # largest single-block contraction dim (keeps VMEM modest)
_TM_CAP = 256      # largest M tile


def _ru(x, m):
    return ((x + m - 1) // m) * m


def _pair(v):
    return (v, v) if isinstance(v, int) else tuple(v)


def _k_tiling(K):
    """Return (TK, Kp): K tile and padded K for the weight matrix."""
    if K <= _K_CAP:
        return K, K
    n = -(-K // _K_CAP)
    TK = _ru(-(-K // n), 128)
    return TK, TK * n


def _m_tiling(M):
    if M <= _TM_CAP:
        return _ru(M, 8)
    n = -(-M // _TM_CAP)
    return _ru(-(-M // n), 8)


def _mm_dtype(lane_dim):
    # bf16 feeds the MXU at full rate; keep very narrow lane dims in f32.
    return jnp.bfloat16 if lane_dim >= 16 else jnp.float32


# ----------------------------------------------------------------------------
# Pallas matmul kernels: bf16 MXU operands, fused bias + activation epilogue
# ----------------------------------------------------------------------------
def _epilogue(r, act):
    if act == "relu":
        return jnp.maximum(r, 0.0)
    if act == "relu6":
        return jnp.clip(r, 0.0, 6.0)
    if act == "sigmoid":
        return jax.nn.sigmoid(r)
    if act == "hswish":
        return r * jnp.clip(r + 3.0, 0.0, 6.0) * (1.0 / 6.0)
    return r


def _mm_kernel_single(a_ref, b_ref, bias_ref, o_ref, *, act):
    # full-K single block: no accumulator scratch, epilogue written directly
    r = jnp.dot(a_ref[...], b_ref[...], preferred_element_type=jnp.float32)
    o_ref[...] = _epilogue(r + bias_ref[...], act).astype(o_ref.dtype)


def _mm_kernel_acc(a_ref, b_ref, bias_ref, o_ref, acc_ref, *, act):
    k = pl.program_id(1)

    @pl.when(k == 0)
    def _():
        acc_ref[...] = jnp.zeros_like(acc_ref)

    acc_ref[...] += jnp.dot(a_ref[...], b_ref[...],
                            preferred_element_type=jnp.float32)

    @pl.when(k == pl.num_programs(1) - 1)
    def _():
        o_ref[...] = _epilogue(acc_ref[...] + bias_ref[...],
                               act).astype(o_ref.dtype)


_MM_CACHE = {}


def _get_mm(Mp, TM, Kp, TK, N, act, out_dtype):
    key = (Mp, TM, Kp, TK, N, act, str(out_dtype))
    fn = _MM_CACHE.get(key)
    if fn is not None:
        return fn
    if TK == Kp:  # single K block
        fn = pl.pallas_call(
            functools.partial(_mm_kernel_single, act=act),
            out_shape=jax.ShapeDtypeStruct((Mp, N), out_dtype),
            grid_spec=pltpu.PrefetchScalarGridSpec(
                num_scalar_prefetch=0,
                grid=(Mp // TM,),
                in_specs=[
                    pl.BlockSpec((TM, Kp), lambda i: (i, 0)),
                    pl.BlockSpec((Kp, N), lambda i: (0, 0)),
                    pl.BlockSpec((1, N), lambda i: (0, 0)),
                ],
                out_specs=pl.BlockSpec((TM, N), lambda i: (i, 0)),
            ),
            compiler_params=pltpu.CompilerParams(
                dimension_semantics=("parallel",)),
        )
    else:
        fn = pl.pallas_call(
            functools.partial(_mm_kernel_acc, act=act),
            out_shape=jax.ShapeDtypeStruct((Mp, N), out_dtype),
            grid_spec=pltpu.PrefetchScalarGridSpec(
                num_scalar_prefetch=0,
                grid=(Mp // TM, Kp // TK),
                in_specs=[
                    pl.BlockSpec((TM, TK), lambda i, k: (i, k)),
                    pl.BlockSpec((TK, N), lambda i, k: (k, 0)),
                    pl.BlockSpec((1, N), lambda i, k: (0, 0)),
                ],
                out_specs=pl.BlockSpec((TM, N), lambda i, k: (i, 0)),
                scratch_shapes=[pltpu.VMEM((TM, N), jnp.float32)],
            ),
            compiler_params=pltpu.CompilerParams(
                dimension_semantics=("parallel", "arbitrary")),
        )
    _MM_CACHE[key] = fn
    return fn


def pallas_matmul(a, wm, bias, act=None):
    """a: (M, K) activations; wm: (Kp, N) pre-transposed / pre-padded weights;
    bias: (1, N) float32.  Returns (M, N)."""
    M, K = a.shape
    Kp, N = wm.shape
    TK, Kp_expected = _k_tiling(K)
    assert Kp == Kp_expected, (K, Kp, Kp_expected)
    a = a.astype(_mm_dtype(K))
    if Kp != K:
        a = jnp.pad(a, ((0, 0), (0, Kp - K)))
    TM = _m_tiling(M)
    Mp = _ru(M, TM)
    if Mp != M:
        a = jnp.pad(a, ((0, Mp - M), (0, 0)))
    out = _get_mm(Mp, TM, Kp, TK, N, act, _mm_dtype(N))(a, wm, bias)
    if Mp != M:
        out = out[:M]
    return out


# ----------------------------------------------------------------------------
# Fused elementwise gating kernel (tiled, channel-broadcast inside the kernel)
# ----------------------------------------------------------------------------
_EW_FNS = {
    "gate_fma":  lambda x, p, g: x * p + g,                   # x1*psi + g1
    "psi_gate":  lambda p, w, o: p * w + o,                   # psi*w + out
    "bg":        lambda x, t: (1.0 - jax.nn.sigmoid(x)) * t,  # background mask
    "edge":      lambda x, l: x * l + x,                      # laplace edge fusion
    "msag_gate": lambda x, a: x + x * a,                      # MSAG gating
}
_EW_CACHE = {}


def ew(name, *arrs):
    """Fused elementwise op over NHWC tensors; single-channel operands are
    broadcast along the channel (lane) axis inside the kernel."""
    full = max(arrs, key=lambda a: a.shape[-1])
    Nb, H, W, C = full.shape
    R = Nb * H * W
    chans = [a.shape[-1] for a in arrs]
    ins = [a.reshape(R, c) for a, c in zip(arrs, chans)]
    TR = min(_ru(R, 8), 512)
    Rp = _ru(R, TR)
    if Rp != R:
        ins = [jnp.pad(a, ((0, Rp - R), (0, 0))) for a in ins]
    key = (name, Rp, TR, C, tuple(chans), tuple(str(a.dtype) for a in ins))
    fn = _EW_CACHE.get(key)
    if fn is None:
        f = _EW_FNS[name]

        def kernel(*refs):
            vals = [r[...].astype(jnp.float32) for r in refs[:-1]]
            refs[-1][...] = f(*vals).astype(refs[-1].dtype)

        fn = pl.pallas_call(
            kernel,
            out_shape=jax.ShapeDtypeStruct((Rp, C), jnp.bfloat16),
            grid_spec=pltpu.PrefetchScalarGridSpec(
                num_scalar_prefetch=0,
                grid=(Rp // TR,),
                in_specs=[pl.BlockSpec((TR, c), lambda i: (i, 0))
                          for c in chans],
                out_specs=pl.BlockSpec((TR, C), lambda i: (i, 0)),
            ),
            compiler_params=pltpu.CompilerParams(
                dimension_semantics=("parallel",)),
        )
        _EW_CACHE[key] = fn
    out = fn(*ins)
    if Rp != R:
        out = out[:R]
    return out.reshape(Nb, H, W, C)


# ----------------------------------------------------------------------------
# Convolution = (reshape | im2col) + Pallas matmul
# ----------------------------------------------------------------------------
def _im2col(x, kh, kw, stride, padding, dilation):
    # TODO(synk): materializes the kh*kw column matrix in HBM (bf16); an
    #             in-kernel halo-block im2col would cut A-side traffic further.
    sh, sw = stride
    ph, pw = padding
    dh, dw = dilation
    xp = jnp.pad(x, ((0, 0), (ph, ph), (pw, pw), (0, 0)))
    Nb, Hp, Wp, C = xp.shape
    OH = (Hp - (dh * (kh - 1) + 1)) // sh + 1
    OW = (Wp - (dw * (kw - 1) + 1)) // sw + 1
    cols = []
    for i in range(kh):
        for j in range(kw):
            cols.append(xp[:, i * dh: i * dh + sh * (OH - 1) + 1: sh,
                           j * dw: j * dw + sw * (OW - 1) + 1: sw, :])
    col = jnp.concatenate(cols, axis=-1)
    return col.reshape(Nb * OH * OW, kh * kw * C), (Nb, OH, OW)


# ----------------------------------------------------------------------------
# Deterministic parameter factory
# ----------------------------------------------------------------------------
class PF:
    def __init__(self, seed=0):
        self.key = jax.random.PRNGKey(seed)
        self.n = 0

    def uniform(self, shape, bound):
        self.n += 1
        k = jax.random.fold_in(self.key, self.n)
        return jax.random.uniform(k, shape, jnp.float32, -bound, bound)


class Conv2d:
    """Conv2d with weights pre-transposed / pre-padded to the Pallas matmul
    layout, eval-mode BatchNorm folded into weight & bias, bf16 MXU operands."""

    def __init__(self, pf, cin, cout, k, stride=1, padding=0, dilation=1,
                 bias=True, bn=False):
        kh, kw = _pair(k)
        self.kh, self.kw, self.cin, self.cout = kh, kw, cin, cout
        self.stride = _pair(stride)
        self.padding = _pair(padding)
        self.dilation = _pair(dilation)
        bound = 1.0 / float(np.sqrt(cin * kh * kw))
        w = pf.uniform((cout, cin, kh, kw), bound)
        b = pf.uniform((cout,), bound) if bias else jnp.zeros((cout,), jnp.float32)
        scale = BN_SCALE if bn else 1.0
        K = kh * kw * cin
        wm = jnp.transpose(w, (2, 3, 1, 0)).reshape(K, cout) * scale
        _, Kp = _k_tiling(K)
        if Kp != K:
            wm = jnp.pad(wm, ((0, Kp - K), (0, 0)))
        self.wm = wm.astype(_mm_dtype(cout))
        self.bias = (b * scale).astype(jnp.float32).reshape(1, cout)

    def __call__(self, x, act=None):
        if (self.kh == 1 and self.kw == 1 and self.stride == (1, 1)
                and self.padding == (0, 0)):
            Nb, H, W, C = x.shape
            col, OH, OW = x.reshape(Nb * H * W, C), H, W
        else:
            col, (Nb, OH, OW) = _im2col(x, self.kh, self.kw, self.stride,
                                        self.padding, self.dilation)
        y = pallas_matmul(col, self.wm, self.bias, act=act)
        return y.reshape(Nb, OH, OW, self.cout)


class BasicConv2d:  # Conv(no bias) -> BN(eval, folded) -> ReLU (fused epilogue)
    def __init__(self, pf, cin, cout, k, stride=1, padding=0, dilation=1):
        self.conv = Conv2d(pf, cin, cout, k, stride, padding, dilation,
                           bias=False, bn=True)

    def __call__(self, x):
        return self.conv(x, act="relu")


def seq(mods, x):
    for m in mods:
        x = m(x)
    return x


# ----------------------------------------------------------------------------
# Data movement glue
# ----------------------------------------------------------------------------
_INTERP_CACHE = {}


def _interp_matrix(insz, outsz):
    key = (insz, outsz)
    m = _INTERP_CACHE.get(key)
    if m is None:
        if insz == 1:
            mat = np.ones((outsz, 1), np.float32)
        else:
            src = np.arange(outsz, dtype=np.float64) * (insz - 1) / (outsz - 1)
            i0 = np.clip(np.floor(src).astype(np.int64), 0, insz - 2)
            frac = (src - i0).astype(np.float32)
            mat = np.zeros((outsz, insz), np.float32)
            mat[np.arange(outsz), i0] = 1.0 - frac
            mat[np.arange(outsz), i0 + 1] = frac
        m = jnp.asarray(mat)
        _INTERP_CACHE[key] = m
    return m


def upsample_bilinear(x, scale):  # align_corners=True, matmul-based resize
    Nb, H, W, C = x.shape
    mh = _interp_matrix(H, H * scale)
    mw = _interp_matrix(W, W * scale)
    y = jnp.einsum('oh,nhwc->nowc', mh, x)
    y = jnp.einsum('pw,nowc->nopc', mw, y)
    return y


def maxpool2(x):
    Nb, H, W, C = x.shape
    return x.reshape(Nb, H // 2, 2, W // 2, 2, C).max(axis=(2, 4))


# ----------------------------------------------------------------------------
# Sub-modules
# ----------------------------------------------------------------------------
_LAP_WM = jnp.asarray(np.array([[-1., -1., -1.],
                                [-1., 8., -1.],
                                [-1., -1., -1.]], np.float32).reshape(9, 1))
_LAP_BIAS = jnp.zeros((1, 1), jnp.float32)


def make_laplace(x):
    # TODO(synk): original make_laplace unavailable; 3x3 Laplacian filter used.
    col, (Nb, OH, OW) = _im2col(x, 3, 3, (1, 1), (1, 1), (1, 1))
    y = pallas_matmul(col, _LAP_WM, _LAP_BIAS)
    return y.reshape(Nb, OH, OW, 1)


class CoordAtt:
    # TODO(synk): CoordAtt source not provided; standard coordinate-attention used.
    def __init__(self, pf, inp, oup, reduction=32):
        mip = max(8, inp // reduction)
        self.conv1 = Conv2d(pf, inp, mip, 1, bn=True)
        self.conv_h = Conv2d(pf, mip, oup, 1)
        self.conv_w = Conv2d(pf, mip, oup, 1)

    def __call__(self, x):
        n, h, w, c = x.shape
        x_h = jnp.mean(x, axis=2, keepdims=True)                     # (n,h,1,c)
        x_w = jnp.transpose(jnp.mean(x, axis=1, keepdims=True), (0, 2, 1, 3))
        y = jnp.concatenate([x_h, x_w], axis=1)                      # (n,h+w,1,c)
        y = self.conv1(y, act="hswish")
        yh, yw = y[:, :h], jnp.transpose(y[:, h:], (0, 2, 1, 3))
        a_h = self.conv_h(yh, act="sigmoid")
        a_w = self.conv_w(yw, act="sigmoid")
        return x * a_h * a_w


class MSAG:
    # TODO(synk): MSAG source not provided; standard multi-scale attention gate used.
    def __init__(self, pf, channel):
        self.point = Conv2d(pf, channel, channel, 1, bias=False, bn=True)
        self.ordin = Conv2d(pf, channel, channel, 3, 1, 1, bias=False, bn=True)
        self.dilat = Conv2d(pf, channel, channel, 3, 1, 2, dilation=2,
                            bias=False, bn=True)
        self.vote = Conv2d(pf, channel * 3, channel, 1, bias=False, bn=True)

    def __call__(self, x):
        x1 = self.point(x, act="relu")
        x2 = self.ordin(x, act="relu")
        x3 = self.dilat(x, act="relu")
        att = self.vote(jnp.concatenate([x1, x2, x3], axis=-1), act="sigmoid")
        return ew("msag_gate", x, att)


class FilterLayer:
    def __init__(self, pf, in_planes, out_planes, reduction=16):
        hid = max(1, out_planes // reduction)
        b1 = 1.0 / float(np.sqrt(in_planes))
        b2 = 1.0 / float(np.sqrt(hid))
        self.w1 = pf.uniform((hid, in_planes), b1).T.astype(_mm_dtype(hid))
        self.b1 = pf.uniform((hid,), b1).reshape(1, hid).astype(jnp.float32)
        self.w2 = pf.uniform((out_planes, hid), b2).T.astype(_mm_dtype(out_planes))
        self.b2 = pf.uniform((out_planes,), b2).reshape(1, out_planes).astype(jnp.float32)
        self.out_planes = out_planes

    def __call__(self, x):  # NHWC
        xf = x.astype(jnp.float32)
        y = jnp.mean(xf, axis=(1, 2)) + jnp.max(xf, axis=(1, 2))     # (B, C)
        h = pallas_matmul(y, self.w1, self.b1, act="relu")
        o = pallas_matmul(h, self.w2, self.b2, act="sigmoid")
        return o.reshape(x.shape[0], 1, 1, self.out_planes)


class FSP:
    def __init__(self, pf, in_planes, out_planes, reduction=16):
        self.filter = FilterLayer(pf, 2 * in_planes, out_planes, reduction)

    def __call__(self, x, e, t):
        xe_w = self.filter(jnp.concatenate([x, e], axis=-1))
        xt_w = self.filter(jnp.concatenate([x, t], axis=-1))
        rec_e = xe_w * e
        rec_t = xt_w * t
        rec_x = x * (xe_w + xt_w + 1.0)     # == xe_w*x + xt_w*x + x
        return rec_x, rec_e, rec_t


class FEEM:
    def __init__(self, pf, in_planes, reduction=16):
        self.fsp = FSP(pf, in_planes, in_planes, reduction)
        self.conv1 = Conv2d(pf, in_planes * 2, in_planes, 1)

    def __call__(self, x, e, t):
        rec_x, rec_e, rec_t = self.fsp(x, e, t)
        rec_xe = self.conv1(jnp.concatenate([rec_x + rec_e, rec_x + e], axis=-1))
        rec_xt = self.conv1(jnp.concatenate([rec_x + rec_t, rec_x + t], axis=-1))
        return self.conv1(jnp.concatenate([rec_xt, rec_xe], axis=-1)) + rec_x


class Attention_block:
    def __init__(self, pf, F_g):
        self.W_x = Conv2d(pf, F_g, F_g, 3, 1, 1)
        self.psi = Conv2d(pf, F_g, 1, 1, bias=True, bn=True)  # conv+BN(1)+sigmoid
        self.msag = MSAG(pf, F_g)

    def __call__(self, x, g):
        g1 = self.msag(g)
        x1 = self.W_x(x)
        psi = self.psi(g1 + x1, act="sigmoid")
        return ew("gate_fma", x1, psi, g1)


class EAM:  # EAM and TAM have identical forward semantics
    def __init__(self, pf, hidden_dim):
        self.conv3 = BasicConv2d(pf, hidden_dim * 2, hidden_dim, 1)
        self.conv3_1 = Conv2d(pf, hidden_dim * 3, hidden_dim, 1)
        self.conv5 = BasicConv2d(pf, hidden_dim, hidden_dim, 3, 1, 1)
        self.ca = CoordAtt(pf, hidden_dim, hidden_dim)
        self.conv_f1 = BasicConv2d(pf, hidden_dim, hidden_dim // 4, 1)
        self.conv_f2 = Conv2d(pf, hidden_dim // 4, 1, 1)

    def __call__(self, x, x1, x2):
        tmp = x
        x = self.conv3_1(jnp.concatenate([x, x1, x2], axis=-1)) + tmp
        x_bg = ew("bg", x, tmp)
        pred_f = self.conv_f2(self.conv_f1(x), act="sigmoid")
        lap = make_laplace(pred_f)
        pred_edge = ew("edge", x, lap)
        pred_edge = jnp.concatenate([pred_edge, x_bg], axis=-1)
        x_out = self.conv3(pred_edge)
        x_out = self.conv5(x_out)
        return self.ca(x_out)


TAM = EAM


class RF:
    def __init__(self, pf, in_channel, out_channel):
        oc = out_channel
        self.b1 = [BasicConv2d(pf, oc, oc, (1, 3), padding=(0, 1)),
                   BasicConv2d(pf, oc, oc, (3, 1), padding=(1, 0)),
                   BasicConv2d(pf, oc, oc, 3, padding=3, dilation=3)]
        self.b2 = [BasicConv2d(pf, oc, oc, (1, 5), padding=(0, 2)),
                   BasicConv2d(pf, oc, oc, (5, 1), padding=(2, 0)),
                   BasicConv2d(pf, oc, oc, 3, padding=5, dilation=5)]
        self.b3 = [BasicConv2d(pf, oc, oc, (1, 7), padding=(0, 3)),
                   BasicConv2d(pf, oc, oc, (7, 1), padding=(3, 0)),
                   BasicConv2d(pf, oc, oc, 3, padding=7, dilation=7)]
        self.conv_cat = BasicConv2d(pf, 3 * oc, oc, 3, padding=1)
        self.ca = CoordAtt(pf, in_channel, oc)

    def __call__(self, x):
        x1 = seq(self.b1, x)
        x2 = seq(self.b2, x)
        x3 = seq(self.b3, x)
        tmp = x1 + x2 + x3
        x_cat = self.conv_cat(jnp.concatenate([x3, x1, x2], axis=-1))
        return self.ca(x_cat + tmp) + x


# ----------------------------------------------------------------------------
# SGNet
# ----------------------------------------------------------------------------
class SGNet:
    def __init__(self, pf, channel=32):
        # TODO(synk): pvt_v2_b2 backbone stub — strides 4/8/16/32, ch 64/128/320/512
        self.stem1 = Conv2d(pf, 3, 64, 4, stride=4)
        self.stem2 = Conv2d(pf, 64, 128, 2, stride=2)
        self.stem3 = Conv2d(pf, 128, 320, 2, stride=2)
        self.stem4 = Conv2d(pf, 320, 512, 2, stride=2)

        self.mccm4 = RF(pf, 512, 512)
        self.mccm3 = RF(pf, 320, 320)
        self.mccm2 = RF(pf, 128, 128)
        self.mccm1 = RF(pf, 64, 64)
        self.tam = EAM(pf, 64)
        self.eam = TAM(pf, 64)
        self.ff4 = MSAG(pf, 512)
        self.ff3 = Attention_block(pf, 320)
        self.ff2 = Attention_block(pf, 128)
        self.ff1 = Attention_block(pf, 64)
        self.feem1 = FEEM(pf, 64)
        self.feem2 = FEEM(pf, 128)
        self.feem3 = FEEM(pf, 320)
        self.feem4 = FEEM(pf, 512)
        self.out4 = Conv2d(pf, 512, 320, 1)
        self.out3 = Conv2d(pf, 320, 128, 1)
        self.out2 = Conv2d(pf, 128, 64, 1)
        self.final_out = [BasicConv2d(pf, 64, 16, 1), Conv2d(pf, 16, 1, 1)]
        self.final_out2 = [BasicConv2d(pf, 512, 128, 1),
                           BasicConv2d(pf, 128, 16, 1), Conv2d(pf, 16, 1, 1)]
        self.final_out3 = [BasicConv2d(pf, 320, 16, 1), Conv2d(pf, 16, 1, 1)]
        self.final_out4 = [BasicConv2d(pf, 128, 16, 1), Conv2d(pf, 16, 1, 1)]
        self.conv_up = Conv2d(pf, 64, 128, 1)
        self.conv_up2 = Conv2d(pf, 128, 320, 1)
        self.conv_up3 = Conv2d(pf, 320, 512, 1)
        self.W_x = Conv2d(pf, 128, 128, 3, 1, 1)
        self.psi = Conv2d(pf, 128, 1, 1, bias=True, bn=True)
        self.W_x2 = Conv2d(pf, 64, 64, 3, 1, 1)
        self.psi2 = Conv2d(pf, 64, 1, 1, bias=True, bn=True)

    def __call__(self, x):  # x: NHWC
        up = lambda z: upsample_bilinear(z, 2)

        x1 = self.stem1(x, act="relu")
        x2 = self.stem2(x1, act="relu")
        x3 = self.stem3(x2, act="relu")
        x4 = self.stem4(x3, act="relu")

        x4_up = self.out2(up(self.out3(up(self.out4(up(x4))))))
        x3_up = self.out2(up(self.out3(up(x3))))
        x2_up = self.out2(up(x2))

        e = self.eam(x1, x2_up, x4_up)
        t = self.tam(x1, x3_up, x4_up)

        p2_up = self.conv_up(maxpool2(e))
        p2_up2 = self.conv_up2(maxpool2(p2_up))
        p2_up3 = self.conv_up3(maxpool2(p2_up2))
        p3_up = self.conv_up(maxpool2(t))
        p3_up2 = self.conv_up2(maxpool2(p3_up))
        p3_up3 = self.conv_up3(maxpool2(p3_up2))

        x1_fe = self.feem1(self.mccm1(x1), e, t)
        x2_fe = self.feem2(self.mccm2(x2), p2_up, p3_up)
        x3_fe = self.feem3(self.mccm3(x3), p2_up2, p3_up2)
        x4_fe = self.feem4(self.mccm4(x4), p2_up3, p3_up3)

        x4_out = self.ff4(x4_fe)
        x4_out_up = self.out4(up(x4_out))
        x4_out_up2 = self.out3(up(x4_out_up))
        x4_out_up3 = self.out2(up(x4_out_up2))

        x3_out = self.ff3(x3_fe, x4_out_up)
        x3_out_up = self.out3(up(x3_out))
        x3_out_up2 = self.out2(up(x3_out_up))

        x2_out = self.ff2(x2_fe, x3_out_up)
        x4_out_up2 = self.W_x(x4_out_up2)
        psi = self.psi(x2_out + x4_out_up2, act="sigmoid")
        x2_out = ew("psi_gate", psi, x4_out_up2, x2_out)
        x2_out_up = self.out2(up(x2_out))

        x1_out = self.ff1(x1_fe, x2_out_up)
        x3_out_up2 = self.W_x2(x3_out_up2)
        psi2 = self.psi2(x1_out + x3_out_up2, act="sigmoid")
        x1_out = ew("psi_gate", psi2, x3_out_up2, x1_out)
        x4_out_up3 = self.W_x2(x4_out_up3)
        psi2b = self.psi2(x1_out + x4_out_up3, act="sigmoid")
        x1_out = ew("psi_gate", psi2b, x4_out_up3, x1_out)

        p3 = upsample_bilinear(seq(self.final_out4, x2_out), 8)
        p4 = upsample_bilinear(seq(self.final_out3, x3_out), 16)
        p5 = upsample_bilinear(seq(self.final_out2, x4_out), 32)
        x1_out = upsample_bilinear(x1_out, 4)
        p1 = seq(self.final_out, x1_out)
        e = upsample_bilinear(seq(self.final_out, e), 4)
        t = upsample_bilinear(seq(self.final_out, t), 4)
        return p1, e, t, p3, p4, p5


def sgnet_forward(net, x_nchw):
    x = jnp.transpose(x_nchw, (0, 2, 3, 1))              # NCHW -> NHWC
    outs = net(x)
    return tuple(jnp.transpose(o.astype(jnp.float32), (0, 3, 1, 2))
                 for o in outs)                           # back to NCHW


if __name__ == "__main__":
    pf = PF(0)
    net = SGNet(pf)
    key = jax.random.PRNGKey(0)
    x = jax.random.normal(key, (1, 3, 64, 64), jnp.float32)   # small NCHW input
    outs = sgnet_forward(net, x)
    for o in outs:
        jax.block_until_ready(o)
    assert all(o.shape == (1, 1, 64, 64) for o in outs)
    assert all(bool(jnp.all(jnp.isfinite(o))) for o in outs)
    print("KERNEL_OK")
</pallas_src>

<mosaic_0001>
module attributes {stable_mosaic.version = 11 : i64} {
  func.func @_mm_kernel_single(%arg0: i32, %arg1: memref<256x48xbf16, #tpu.memory_space<vmem>>, %arg2: memref<48x64xbf16, #tpu.memory_space<vmem>>, %arg3: memref<1x64xf32, #tpu.memory_space<vmem>>, %arg4: memref<256x64xbf16, #tpu.memory_space<vmem>>) attributes {dimension_semantics = [#tpu.dimension_semantics<parallel>], iteration_bounds = array<i64: 1>, scalar_prefetch = 0 : i64, scratch_operands = 0 : i64, tpu.core_type = #tpu.core_type<tc>, window_params = [{transform_indices = @transform_0, window_bounds = array<i64: 256, 48>}, {pipeline_mode = #tpu.pipeline_mode<synchronous>, transform_indices = @transform_1, window_bounds = array<i64: 48, 64>}, {pipeline_mode = #tpu.pipeline_mode<synchronous>, transform_indices = @transform_2, window_bounds = array<i64: 1, 64>}, {transform_indices = @transform_3, window_bounds = array<i64: 256, 64>}]} {
    %c0 = arith.constant 0 : index
    %c0_0 = arith.constant 0 : index
    %0 = vector.load %arg1[%c0, %c0_0] : memref<256x48xbf16, #tpu.memory_space<vmem>>, vector<256x48xbf16>
    %c0_1 = arith.constant 0 : index
    %c0_2 = arith.constant 0 : index
    %1 = vector.load %arg2[%c0_1, %c0_2] : memref<48x64xbf16, #tpu.memory_space<vmem>>, vector<48x64xbf16>
    %cst = arith.constant dense<0.000000e+00> : vector<256x64xf32>
    %2 = tpu.matmul %0, %1, %cst {dimension_numbers = #tpu.dot_dimension_numbers<[1], [0], [0], [1], [0, 0, 1, 1], [], []>} : vector<256x48xbf16>, vector<48x64xbf16>, vector<256x64xf32> -> vector<256x64xf32>
    %c0_3 = arith.constant 0 : index
    %c0_4 = arith.constant 0 : index
    %3 = vector.load %arg3[%c0_3, %c0_4] : memref<1x64xf32, #tpu.memory_space<vmem>>, vector<1x64xf32>
    %4 = vector.broadcast %3 : vector<1x64xf32> to vector<256x64xf32>
    %5 = arith.addf %2, %4 : vector<256x64xf32>
    %cst_5 = arith.constant 0.000000e+00 : f32
    %6 = vector.broadcast %cst_5 : f32 to vector<256x64xf32>
    %7 = arith.maximumf %5, %6 : vector<256x64xf32>
    %8 = arith.truncf %7 : vector<256x64xf32> to vector<256x64xbf16>
    %c0_6 = arith.constant 0 : index
    %c0_7 = arith.constant 0 : index
    %9 = vector.load %arg4[%c0_6, %c0_7] : memref<256x64xbf16, #tpu.memory_space<vmem>>, vector<256x64xbf16>
    tpu.vector_store %arg4[%c0_6, %c0_7], %8 {strides = array<i32>} : memref<256x64xbf16, #tpu.memory_space<vmem>>, vector<256x64xbf16>,
    return
  }
  func.func @transform_0(%arg0: i32) -> (i32, i32) {
    %c0_i32 = arith.constant 0 : i32
    %c0_i32_0 = arith.constant 0 : i32
    return %arg0, %c0_i32 : i32, i32
  }
  func.func @transform_1(%arg0: i32) -> (i32, i32) {
    %c0_i32 = arith.constant 0 : i32
    %c0_i32_0 = arith.constant 0 : i32
    %c0_i32_1 = arith.constant 0 : i32
    return %c0_i32, %c0_i32_0 : i32, i32
  }
  func.func @transform_2(%arg0: i32) -> (i32, i32) {
    %c0_i32 = arith.constant 0 : i32
    %c0_i32_0 = arith.constant 0 : i32
    %c0_i32_1 = arith.constant 0 : i32
    return %c0_i32, %c0_i32_0 : i32, i32
  }
  func.func @transform_3(%arg0: i32) -> (i32, i32) {
    %c0_i32 = arith.constant 0 : i32
    %c0_i32_0 = arith.constant 0 : i32
    return %arg0, %c0_i32 : i32, i32
  }
}

</mosaic_0001>

<bundles_post_ra>
// kernel: tpu_custom_call.1
= control target key start
LH: loop header
LB: loop body
LE: loop exit
PB: predicated region body
PF: predicated region fallthrough
CT: control target
= control target key end

     0   :  { %vm158_vm0 = vcmask 392192   ;;  %vm528_vm1 = vcmask 519168   ;;  %s1005_s1 = inlined_call_operand.vmem [shape: bf16[48,64], index: 1, kind: input, shape index: {}]   ;;  %s1006_s0 = inlined_call_operand.vmem [shape: bf16[256,48], index: 0, kind: input, shape index: {}]   ;;  %s1007_s2 = inlined_call_operand.vmem [shape: f32[1,64], index: 2, kind: input, shape index: {}]   ;;  %s1008_s3 = inlined_call_operand.vmem [shape: bf16[256,64], index: 3, kind: output, shape index: {}]  }
   0x1   :  { %v728_v0 = vld [vmem:[%s1005_s1 + $0x10] sm:$0xff]   ;;  %v729_v1 = vld [vmem:[%s1005_s1 + $0x8] sm:$0xff]   ;;  %v730_v2 = vld [vmem:[%s1005_s1] sm:$0xff]  }
   0x2   :  { %684 = vmatprep.subr.bf16.mxu0 %v728_v0  ;;  %722 = vmatprep.subr.bf16.mxu1 %v728_v0  ;;  %v731_v3 = vld [vmem:[%s1006_s0] sm:$0xff]   ;;  %v733_v5 = vld [vmem:[%s1006_s0 + $0x8] sm:$0xff]   ;;  %v735_v7 = vld [vmem:[%s1006_s0 + $0x10] sm:$0xff]  }
   0x3   :  { %685 = vmatpush3.bf16.msra.mxu0 %v728_v0  ;;  %725 = vmatpush3.bf16.msra.mxu1 %v728_v0  ;;  %v732_v4 = vld [vmem:[%s1006_s0 + $0x40] sm:$0xff]   ;;  %v734_v6 = vld [vmem:[%s1006_s0 + $0x48] sm:$0xff]   ;;  %v736_v8 = vld [vmem:[%s1006_s0 + $0x50] sm:$0xff]  }
   0x4   :  { %686 = vmatprep.subr.bf16.mxu0 %v729_v1  ;;  %723 = vmatprep.subr.bf16.mxu1 %v729_v1  ;;  %v737_v9 = vld [vmem:[%s1006_s0 + $0x18] sm:$0xff]   ;;  %v739_v11 = vld [vmem:[%s1006_s0 + $0x20] sm:$0xff]   ;;  %v741_v13 = vld [vmem:[%s1006_s0 + $0x28] sm:$0xff]  }
   0x5   :  { %690 = vmatprep.mubr.msk.bf16.mxu0 %vm158_vm0, %v731_v3  ;;  %706 = vmatprep.mubr.msk.bf16.mxu1 %vm158_vm0, %v732_v4  ;;  %v738_v10 = vld [vmem:[%s1006_s0 + $0x58] sm:$0xff]   ;;  %v740_v12 = vld [vmem:[%s1006_s0 + $0x60] sm:$0xff]   ;;  %v742_v14 = vld [vmem:[%s1006_s0 + $0x68] sm:$0xff]  }
   0x6   :  { %v743_v15 = vld [vmem:[%s1006_s0 + $0x30] sm:$0xff]   ;;  %v745_v17 = vld [vmem:[%s1006_s0 + $0x38] sm:$0xff]   ;;  %v843_v19 = vld [vmem:[%s1007_s2] ss:$0 sm:$0xff] }
   0x7   :  { %687 = vmatpush3.bf16.msra.mxu0 %v729_v1  ;;  %726 = vmatpush3.bf16.msra.mxu1 %v729_v1  ;;  %v744_v16 = vld [vmem:[%s1006_s0 + $0x70] sm:$0xff]   ;;  %v746_v18 = vld [vmem:[%s1006_s0 + $0x78] sm:$0xff]  }
   0x8   :  { %688 = vmatprep.subr.bf16.mxu0 %v730_v2  ;;  %724 = vmatprep.subr.bf16.mxu1 %v730_v2 }
   0xb   :  { %689 = vmatpush3.bf16.msra.mxu0 %v730_v2  ;;  %727 = vmatpush3.bf16.msra.mxu1 %v730_v2 }
   0xe   :  { %691 = vmatmul.mubr.msk.bf16.vlgmr.msra.gmra.mxu0 %vm158_vm0, %v733_v5  ;;  %707 = vmatmul.mubr.msk.bf16.vlgmr.msra.gmra.mxu1 %vm158_vm0, %v734_v6 }
   0xf   :  { %694 = vmatprep.mubr.msk.bf16.mxu0 %vm158_vm0, %v735_v7  ;;  %710 = vmatprep.mubr.msk.bf16.mxu1 %vm158_vm0, %v736_v8 }
  0x16   :  { %695 = vmatmul.mubr.msk.bf16.gmra.mxu0 %vm158_vm0, %v737_v9  ;;  %711 = vmatmul.mubr.msk.bf16.gmra.mxu1 %vm158_vm0, %v738_v10 }
  0x17   :  { %698 = vmatprep.mubr.msk.bf16.mxu0 %vm158_vm0, %v739_v11  ;;  %714 = vmatprep.mubr.msk.bf16.mxu1 %vm158_vm0, %v740_v12 }
  0x1e   :  { %699 = vmatmul.mubr.msk.bf16.gmra.mxu0 %vm158_vm0, %v741_v13  ;;  %715 = vmatmul.mubr.msk.bf16.gmra.mxu1 %vm158_vm0, %v742_v14 }
  0x1f   :  { %702 = vmatprep.mubr.msk.bf16.mxu0 %vm158_vm0, %v743_v15  ;;  %718 = vmatprep.mubr.msk.bf16.mxu1 %vm158_vm0, %v744_v16 }
  0x26   :  { %703 = vmatmul.mubr.msk.bf16.gmra.mxu0 %vm158_vm0, %v745_v17  ;;  %719 = vmatmul.mubr.msk.bf16.gmra.mxu1 %vm158_vm0, %v746_v18 }
  0xce   :  { %v692_v20 = vpop.f32.mrf.mxu0  ;;  %v708_v21 = vpop.f32.mrf.mxu1 }
  0xcf   :  { %v250_v22 = vadd.f32 %v692_v20, %v843_v19  ;;  %v314_v23 = vadd.f32 %v708_v21, %v843_v19 }
  0xd0   :  { %v241_v24 = vpop.f32.mrf.mxu0  ;;  %v305_v25 = vpop.f32.mrf.mxu1 }
  0xd1   :  { %v370_v26 = vmax.f32 %v250_v22, 0.0  ;;  %v386_v27 = vmax.f32 %v314_v23, 0.0  ;;  %v242_v28 = vadd.f32 %v843_v19, %v241_v24  ;;  %v306_v29 = vadd.f32 %v843_v19, %v305_v25 }
  0xd2   :  { %v693_v30 = vpop.f32.mrf.mxu0  ;;  %v709_v31 = vpop.f32.mrf.mxu1 }
  0xd3   :  { %v635_v32 = vpack.c.bf16 %v370_v26, %v370_v26  ;;  %v651_v33 = vpack.c.bf16 %v386_v27, %v386_v27  ;;  %v368_v34 = vmax.f32 %v242_v28, 0.0  ;;  %v384_v35 = vmax.f32 %v306_v29, 0.0 }
  0xd4   :  { %v253_v36 = vadd.f32 %v693_v30, %v843_v19  ;;  %v317_v37 = vadd.f32 %v709_v31, %v843_v19  ;;  %v244_v38 = vpop.f32.mrf.mxu0  ;;  %v308_v39 = vpop.f32.mrf.mxu1 }
  0xd5   :  { %531 = vst.msk [vmem:[%s1008_s3 + $0x8] sm:$0xf] %vm528_vm1, %v635_v32  ;;  %547 = vst.msk [vmem:[%s1008_s3 + $0x48] sm:$0xf] %vm528_vm1, %v651_v33  ;;  %v633_v40 = vpack.c.bf16 %v368_v34, %v368_v34  ;;  %v649_v41 = vpack.c.bf16 %v384_v35, %v384_v35  ;;  %v245_v42 = vadd.f32 %v843_v19, %v244_v38 }
  0xd6   :  { %v309_v43 = vadd.f32 %v843_v19, %v308_v39  ;;  %v371_v44 = vmax.f32 %v253_v36, 0.0  ;;  %v387_v45 = vmax.f32 %v317_v37, 0.0  ;;  %v696_v46 = vpop.f32.mrf.mxu0  ;;  %v712_v47 = vpop.f32.mrf.mxu1 }
  0xd7   :  { %529 = vst.msk [vmem:[%s1008_s3] sm:$0xf] %vm528_vm1, %v633_v40  ;;  %545 = vst.msk [vmem:[%s1008_s3 + $0x40] sm:$0xf] %vm528_vm1, %v649_v41  ;;  %v369_v48 = vmax.f32 %v245_v42, 0.0  ;;  %v266_v50 = vadd.f32 %v696_v46, %v843_v19  ;;  %v330_v51 = vadd.f32 %v712_v47, %v843_v19 }
  0xd8   :  { %v385_v49 = vmax.f32 %v309_v43, 0.0  ;;  %v636_v52 = vpack.c.bf16 %v371_v44, %v371_v44  ;;  %v652_v53 = vpack.c.bf16 %v387_v45, %v387_v45  ;;  %v257_v54 = vpop.f32.mrf.mxu0  ;;  %v321_v55 = vpop.f32.mrf.mxu1 }
  0xd9   :  { %v634_v56 = vpack.c.bf16 %v369_v48, %v369_v48  ;;  %v374_v58 = vmax.f32 %v266_v50, 0.0  ;;  %v390_v59 = vmax.f32 %v330_v51, 0.0  ;;  %v258_v60 = vadd.f32 %v843_v19, %v257_v54 }
  0xda   :  { %v650_v57 = vpack.c.bf16 %v385_v49, %v385_v49  ;;  %532 = vst.msk [vmem:[%s1008_s3 + $0xc] sm:$0xf] %vm528_vm1, %v636_v52  ;;  %548 = vst.msk [vmem:[%s1008_s3 + $0x4c] sm:$0xf] %vm528_vm1, %v652_v53  ;;  %v322_v61 = vadd.f32 %v843_v19, %v321_v55  ;;  %v697_v62 = vpop.f32.mrf.mxu0  ;;  %v713_v63 = vpop.f32.mrf.mxu1 }
  0xdb   :  { %530 = vst.msk [vmem:[%s1008_s3 + $0x4] sm:$0xf] %vm528_vm1, %v634_v56  ;;  %v639_v0 = vpack.c.bf16 %v374_v58, %v374_v58  ;;  %v655_v1 = vpack.c.bf16 %v390_v59, %v390_v59  ;;  %v269_v2 = vadd.f32 %v697_v62, %v843_v19  ;;  %v333_v3 = vadd.f32 %v713_v63, %v843_v19 }
  0xdc   :  { %546 = vst.msk [vmem:[%s1008_s3 + $0x44] sm:$0xf] %vm528_vm1, %v650_v57  ;;  %v372_v4 = vmax.f32 %v258_v60, 0.0  ;;  %v388_v5 = vmax.f32 %v322_v61, 0.0  ;;  %v260_v6 = vpop.f32.mrf.mxu0  ;;  %v324_v7 = vpop.f32.mrf.mxu1 }
  0xdd   :  { %535 = vst.msk [vmem:[%s1008_s3 + $0x18] sm:$0xf] %vm528_vm1, %v639_v0  ;;  %551 = vst.msk [vmem:[%s1008_s3 + $0x58] sm:$0xf] %vm528_vm1, %v655_v1  ;;  %v375_v8 = vmax.f32 %v269_v2, 0.0  ;;  %v391_v9 = vmax.f32 %v333_v3, 0.0  ;;  %v261_v10 = vadd.f32 %v843_v19, %v260_v6  ;;  %v325_v11 = vadd.f32 %v843_v19, %v324_v7 }
  0xde   :  { %v637_v12 = vpack.c.bf16 %v372_v4, %v372_v4  ;;  %v653_v13 = vpack.c.bf16 %v388_v5, %v388_v5  ;;  %v700_v14 = vpop.f32.mrf.mxu0  ;;  %v716_v15 = vpop.f32.mrf.mxu1 }
  0xdf   :  { %v640_v16 = vpack.c.bf16 %v375_v8, %v375_v8  ;;  %v656_v17 = vpack.c.bf16 %v391_v9, %v391_v9  ;;  %v373_v18 = vmax.f32 %v261_v10, 0.0  ;;  %v389_v20 = vmax.f32 %v325_v11, 0.0 }
  0xe0   :  { %533 = vst.msk [vmem:[%s1008_s3 + $0x10] sm:$0xf] %vm528_vm1, %v637_v12  ;;  %549 = vst.msk [vmem:[%s1008_s3 + $0x50] sm:$0xf] %vm528_vm1, %v653_v13  ;;  %v282_v21 = vadd.f32 %v700_v14, %v843_v19  ;;  %v346_v22 = vadd.f32 %v716_v15, %v843_v19  ;;  %v273_v23 = vpop.f32.mrf.mxu0  ;;  %v337_v24 = vpop.f32.mrf.mxu1 }
  0xe1   :  { %536 = vst.msk [vmem:[%s1008_s3 + $0x1c] sm:$0xf] %vm528_vm1, %v640_v16  ;;  %552 = vst.msk [vmem:[%s1008_s3 + $0x5c] sm:$0xf] %vm528_vm1, %v656_v17  ;;  %v638_v25 = vpack.c.bf16 %v373_v18, %v373_v18  ;;  %v654_v26 = vpack.c.bf16 %v389_v20, %v389_v20  ;;  %v274_v27 = vadd.f32 %v843_v19, %v273_v23 }
  0xe2   :  { %v338_v28 = vadd.f32 %v843_v19, %v337_v24  ;;  %v378_v29 = vmax.f32 %v282_v21, 0.0  ;;  %v394_v30 = vmax.f32 %v346_v22, 0.0  ;;  %v701_v31 = vpop.f32.mrf.mxu0  ;;  %v717_v32 = vpop.f32.mrf.mxu1 }
  0xe3   :  { %534 = vst.msk [vmem:[%s1008_s3 + $0x14] sm:$0xf] %vm528_vm1, %v638_v25  ;;  %550 = vst.msk [vmem:[%s1008_s3 + $0x54] sm:$0xf] %vm528_vm1, %v654_v26  ;;  %v376_v33 = vmax.f32 %v274_v27, 0.0  ;;  %v285_v35 = vadd.f32 %v701_v31, %v843_v19  ;;  %v349_v36 = vadd.f32 %v717_v32, %v843_v19 }
  0xe4   :  { %v392_v34 = vmax.f32 %v338_v28, 0.0  ;;  %v643_v37 = vpack.c.bf16 %v378_v29, %v378_v29  ;;  %v659_v38 = vpack.c.bf16 %v394_v30, %v394_v30  ;;  %v276_v39 = vpop.f32.mrf.mxu0  ;;  %v340_v40 = vpop.f32.mrf.mxu1 }
  0xe5   :  { %v641_v41 = vpack.c.bf16 %v376_v33, %v376_v33  ;;  %v379_v43 = vmax.f32 %v285_v35, 0.0  ;;  %v395_v44 = vmax.f32 %v349_v36, 0.0  ;;  %v277_v45 = vadd.f32 %v843_v19, %v276_v39 }
  0xe6   :  { %v657_v42 = vpack.c.bf16 %v392_v34, %v392_v34  ;;  %539 = vst.msk [vmem:[%s1008_s3 + $0x28] sm:$0xf] %vm528_vm1, %v643_v37  ;;  %555 = vst.msk [vmem:[%s1008_s3 + $0x68] sm:$0xf] %vm528_vm1, %v659_v38  ;;  %v341_v46 = vadd.f32 %v843_v19, %v340_v40  ;;  %v704_v47 = vpop.f32.mrf.mxu0  ;;  %v720_v48 = vpop.f32.mrf.mxu1 }
  0xe7   :  { %537 = vst.msk [vmem:[%s1008_s3 + $0x20] sm:$0xf] %vm528_vm1, %v641_v41  ;;  %v644_v49 = vpack.c.bf16 %v379_v43, %v379_v43  ;;  %v660_v50 = vpack.c.bf16 %v395_v44, %v395_v44  ;;  %v298_v51 = vadd.f32 %v704_v47, %v843_v19  ;;  %v362_v52 = vadd.f32 %v720_v48, %v843_v19 }
  0xe8   :  { %553 = vst.msk [vmem:[%s1008_s3 + $0x60] sm:$0xf] %vm528_vm1, %v657_v42  ;;  %v377_v53 = vmax.f32 %v277_v45, 0.0  ;;  %v393_v54 = vmax.f32 %v341_v46, 0.0  ;;  %v289_v55 = vpop.f32.mrf.mxu0  ;;  %v353_v56 = vpop.f32.mrf.mxu1 }
  0xe9   :  { %540 = vst.msk [vmem:[%s1008_s3 + $0x2c] sm:$0xf] %vm528_vm1, %v644_v49  ;;  %556 = vst.msk [vmem:[%s1008_s3 + $0x6c] sm:$0xf] %vm528_vm1, %v660_v50  ;;  %v382_v57 = vmax.f32 %v298_v51, 0.0  ;;  %v398_v58 = vmax.f32 %v362_v52, 0.0  ;;  %v290_v59 = vadd.f32 %v843_v19, %v289_v55  ;;  %v354_v60 = vadd.f32 %v843_v19, %v353_v56 }
  0xea   :  { %v642_v61 = vpack.c.bf16 %v377_v53, %v377_v53  ;;  %v658_v62 = vpack.c.bf16 %v393_v54, %v393_v54  ;;  %v705_v63 = vpop.f32.mrf.mxu0  ;;  %v721_v0 = vpop.f32.mrf.mxu1 }
  0xeb   :  { %v647_v1 = vpack.c.bf16 %v382_v57, %v382_v57  ;;  %v663_v2 = vpack.c.bf16 %v398_v58, %v398_v58  ;;  %v380_v3 = vmax.f32 %v290_v59, 0.0  ;;  %v396_v4 = vmax.f32 %v354_v60, 0.0 }
  0xec   :  { %538 = vst.msk [vmem:[%s1008_s3 + $0x24] sm:$0xf] %vm528_vm1, %v642_v61  ;;  %554 = vst.msk [vmem:[%s1008_s3 + $0x64] sm:$0xf] %vm528_vm1, %v658_v62  ;;  %v301_v5 = vadd.f32 %v705_v63, %v843_v19  ;;  %v365_v6 = vadd.f32 %v721_v0, %v843_v19  ;;  %v292_v7 = vpop.f32.mrf.mxu0  ;;  %v356_v8 = vpop.f32.mrf.mxu1 }
  0xed   :  { %543 = vst.msk [vmem:[%s1008_s3 + $0x38] sm:$0xf] %vm528_vm1, %v647_v1  ;;  %559 = vst.msk [vmem:[%s1008_s3 + $0x78] sm:$0xf] %vm528_vm1, %v663_v2  ;;  %v645_v9 = vpack.c.bf16 %v380_v3, %v380_v3  ;;  %v661_v10 = vpack.c.bf16 %v396_v4, %v396_v4  ;;  %v293_v11 = vadd.f32 %v843_v19, %v292_v7 }
  0xee   :  { %v357_v12 = vadd.f32 %v843_v19, %v356_v8  ;;  %v383_v13 = vmax.f32 %v301_v5, 0.0  ;;  %v399_v14 = vmax.f32 %v365_v6, 0.0 }
  0xef   :  { %541 = vst.msk [vmem:[%s1008_s3 + $0x30] sm:$0xf] %vm528_vm1, %v645_v9  ;;  %557 = vst.msk [vmem:[%s1008_s3 + $0x70] sm:$0xf] %vm528_vm1, %v661_v10  ;;  %v381_v15 = vmax.f32 %v293_v11, 0.0 }
  0xf0   :  { %v397_v16 = vmax.f32 %v357_v12, 0.0  ;;  %v648_v17 = vpack.c.bf16 %v383_v13, %v383_v13  ;;  %v664_v18 = vpack.c.bf16 %v399_v14, %v399_v14 }
  0xf1   :  { %v646_v20 = vpack.c.bf16 %v381_v15, %v381_v15 }
  0xf2   :  { %v662_v21 = vpack.c.bf16 %v397_v16, %v397_v16  ;;  %544 = vst.msk [vmem:[%s1008_s3 + $0x3c] sm:$0xf] %vm528_vm1, %v648_v17  ;;  %560 = vst.msk [vmem:[%s1008_s3 + $0x7c] sm:$0xf] %vm528_vm1, %v664_v18 }
  0xf3   :  { %542 = vst.msk [vmem:[%s1008_s3 + $0x34] sm:$0xf] %vm528_vm1, %v646_v20 }
  0xf4   :  { %558 = vst.msk [vmem:[%s1008_s3 + $0x74] sm:$0xf] %vm528_vm1, %v662_v21 }

</bundles_post_ra>
